<compile_context>
chip_gen: v7x
topology: tpu7x:2x2x1
jax: 0.10.0
libtpu: 0.0.40
codegen_flags: <defaults>
</compile_context>

<pallas_src>
import functools

import jax
import jax.numpy as jnp
from jax import lax
from jax.experimental import pallas as pl
from jax.experimental.pallas import tpu as pltpu


def _mean_dice_kernel(p_ref, t_ref, inter_ref, psum_ref, tsum_ref, *,
                      acc_rows, tail_rows, tile_m, num_splits, m_per_split,
                      ragged):
    s = pl.program_id(1)
    m = pl.program_id(2)

    # New (class, split) output block -> zero the resident accumulators.
    @pl.when(m == 0)
    def _():
        inter_ref[...] = jnp.zeros_like(inter_ref)
        psum_ref[...] = jnp.zeros_like(psum_ref)
        tsum_ref[...] = jnp.zeros_like(tsum_ref)

    def accumulate(mask_tail):
        p = p_ref[:, 0].astype(jnp.float32)          # (B, tile_m, L)
        t = t_ref[:, 0].astype(jnp.float32)
        B = p.shape[0]
        L = p.shape[-1]
        if mask_tail:
            # Static tail length: only the globally-last row tile is ragged, so
            # the OOB (stale-VMEM) rows are zeroed before ANY arithmetic.
            rid = lax.broadcasted_iota(jnp.int32, (1, tile_m, L), 1)
            valid = rid < tail_rows
            p = jnp.where(valid, p, 0.0)
            t = jnp.where(valid, t, 0.0)

        if acc_rows == 8:
            # (B, tile_m, L) -> (B, tile_m//8, 8, L): free split on a sublane
            # boundary; sums over the two outer axes are pure vreg-wise adds.
            ps = p.reshape(B, tile_m // 8, 8, L)
            ts = t.reshape(B, tile_m // 8, 8, L)
            inter_ref[0, 0] += (ps * ts).sum(axis=0).sum(axis=0)
            psum_ref[0, 0] += ps.sum(axis=0).sum(axis=0)
            tsum_ref[0, 0] += ts.sum(axis=0).sum(axis=0)
        else:
            # Tiny whole-array tile (tile_m not a multiple of 8): cheap anyway.
            pt = p * t
            inter_ref[0, 0] += pt.sum(axis=0).sum(axis=0, keepdims=True)
            psum_ref[0, 0] += p.sum(axis=0).sum(axis=0, keepdims=True)
            tsum_ref[0, 0] += t.sum(axis=0).sum(axis=0, keepdims=True)

    if ragged:
        is_last = jnp.logical_and(s == num_splits - 1, m == m_per_split - 1)

        @pl.when(jnp.logical_not(is_last))
        def _():
            accumulate(mask_tail=False)

        @pl.when(is_last)
        def _():
            accumulate(mask_tail=True)
    else:
        accumulate(mask_tail=False)


def mean_dice(outputs, targets, *, smooth=1.0, num_classes=None, tile_rows=None):
    """outputs, targets: (B, C, H, W) NCHW, like the PyTorch module."""
    B, C, H, W = outputs.shape
    assert targets.shape == outputs.shape
    if num_classes is None:
        num_classes = C
    assert 1 <= num_classes <= C, "num_classes may not exceed the channel dim"

    lanes = 128
    HW = H * W
    if HW % lanes == 0:
        # Free, contiguous reshape of NCHW: lanes carry 128 spatial elements.
        rows, L = HW // lanes, lanes
        view = lambda x: x.reshape(B, C, rows, L)
    else:
        # Lane-unaligned H*W: stream native NCHW (no jnp.pad / extra HBM pass);
        # lanes carry W, rows carry H.
        rows, L = H, W
        view = lambda x: x

    p = view(outputs)
    t = view(targets)

    # Tile the row axis.  Keep 2 inputs x 2 buffers x (B, tile_m, L) <= ~24 MiB
    # so the 32 MiB scoped VMEM limit is safe on v5e/v6e/v7x.
    itemsize = max(outputs.dtype.itemsize, targets.dtype.itemsize)
    if tile_rows is None:
        tile_rows = 4096 if itemsize <= 2 else 2048
    budget = 24 * 1024 * 1024
    per_row = max(1, B * L * itemsize * 4)          # 2 inputs x 2 buffers
    cap = max(8, (budget // per_row) // 8 * 8)
    tile_m = min(int(tile_rows), cap)
    if tile_m >= rows:
        tile_m = rows                               # full dim -> always legal
    else:
        tile_m = max(8, (tile_m // 8) * 8)          # sublane-aligned tile

    num_m = pl.cdiv(rows, tile_m)
    ragged = (rows % tile_m) != 0
    tail_rows = rows - (num_m - 1) * tile_m

    # Split the row-tile axis into a second "parallel" grid axis so both v7x
    # TensorCores stay busy when num_classes is 1 / odd.
    num_splits = 2 if (num_classes % 2 == 1 and num_m % 2 == 0 and num_m >= 2) else 1
    m_per_split = num_m // num_splits

    acc_rows = 8 if (tile_m % 8 == 0) else 1

    kernel = functools.partial(
        _mean_dice_kernel,
        acc_rows=acc_rows, tail_rows=tail_rows, tile_m=tile_m,
        num_splits=num_splits, m_per_split=m_per_split, ragged=ragged)

    part_shape = jax.ShapeDtypeStruct((num_classes, num_splits, acc_rows, L),
                                      jnp.float32)
    out_spec = pl.BlockSpec((1, 1, acc_rows, L), lambda c, s, m: (c, s, 0, 0))
    in_spec = pl.BlockSpec((B, 1, tile_m, L),
                           lambda c, s, m: (0, c, s * m_per_split + m, 0))

    inter, psum, tsum = pl.pallas_call(
        kernel,
        out_shape=(part_shape, part_shape, part_shape),
        grid_spec=pltpu.PrefetchScalarGridSpec(
            num_scalar_prefetch=0,
            grid=(num_classes, num_splits, m_per_split),
            in_specs=[in_spec, in_spec],
            out_specs=(out_spec, out_spec, out_spec),
        ),
        compiler_params=pltpu.CompilerParams(
            # class & split axes independent -> megacore-shardable; the row
            # axis carries the resident output accumulators -> sequential.
            dimension_semantics=("parallel", "parallel", "arbitrary"),
            vmem_limit_bytes=32 * 1024 * 1024,
        ),
    )(p, t)

    # Tiny finalize in JAX: collapse lanes/splits, one divide per class, mean.
    inter_c = jnp.sum(inter, axis=(1, 2, 3))
    denom_c = jnp.sum(psum, axis=(1, 2, 3)) + jnp.sum(tsum, axis=(1, 2, 3))
    dice = (2.0 * inter_c + float(smooth)) / (denom_c + float(smooth))
    return jnp.sum(dice) / num_classes


def _reference_mean_dice(outputs, targets, smooth, num_classes):
    score = 0.0
    for c in range(num_classes):
        yt = targets[:, c].astype(jnp.float32).reshape(-1)
        yp = outputs[:, c].astype(jnp.float32).reshape(-1)
        inter = jnp.sum(yt * yp)
        score = score + (2.0 * inter + smooth) / (jnp.sum(yt) + jnp.sum(yp) + smooth)
    return score / num_classes


if __name__ == "__main__":
    smooth = 1.0

    def run_case(key, B, C, H, W, num_classes, tile_rows=None):
        k1, k2 = jax.random.split(key)
        outputs = jax.random.uniform(k1, (B, C, H, W), dtype=jnp.float32)
        targets = (jax.random.uniform(k2, (B, C, H, W)) > 0.5).astype(jnp.float32)
        got = mean_dice(outputs, targets, smooth=smooth,
                        num_classes=num_classes, tile_rows=tile_rows)
        got = jax.block_until_ready(got)
        ref = _reference_mean_dice(outputs, targets, smooth, num_classes)
        assert jnp.allclose(got, ref, rtol=1e-5, atol=1e-5), (
            (B, C, H, W, num_classes), got, ref)

    key = jax.random.PRNGKey(0)
    k0, k1, k2, k3 = jax.random.split(key, 4)
    # Primary small shape (module-consistent): lane-aligned H*W, even classes.
    run_case(k0, B=2, C=4, H=16, W=16, num_classes=4)
    # Lane-unaligned H*W: exercises the native-NCHW (no jnp.pad) path.
    run_case(k1, B=2, C=4, H=12, W=12, num_classes=4)
    # Odd num_classes with several row tiles: exercises the split 'parallel' axis.
    run_case(k2, B=1, C=3, H=64, W=64, num_classes=3, tile_rows=8)
    # Ragged last row tile: exercises the gated tail mask.
    run_case(k3, B=1, C=2, H=72, W=64, num_classes=2, tile_rows=8)

    print("KERNEL_OK")
</pallas_src>

<mosaic_0001>
module attributes {stable_mosaic.version = 11 : i64} {
  func.func @_mean_dice_kernel(%arg0: i32, %arg1: i32, %arg2: i32, %arg3: memref<2x1x2x128xf32, #tpu.memory_space<vmem>>, %arg4: memref<2x1x2x128xf32, #tpu.memory_space<vmem>>, %arg5: memref<1x1x1x128xf32, #tpu.memory_space<vmem>>, %arg6: memref<1x1x1x128xf32, #tpu.memory_space<vmem>>, %arg7: memref<1x1x1x128xf32, #tpu.memory_space<vmem>>) attributes {dimension_semantics = [#tpu.dimension_semantics<parallel>, #tpu.dimension_semantics<parallel>, #tpu.dimension_semantics<arbitrary>], iteration_bounds = array<i64: 4, 1, 1>, scalar_prefetch = 0 : i64, scratch_operands = 0 : i64, tpu.core_type = #tpu.core_type<tc>, window_params = [{transform_indices = @transform_0, window_bounds = array<i64: 2, 1, 2, 128>}, {transform_indices = @transform_1, window_bounds = array<i64: 2, 1, 2, 128>}, {transform_indices = @transform_2, window_bounds = array<i64: 1, 1, 1, 128>}, {transform_indices = @transform_3, window_bounds = array<i64: 1, 1, 1, 128>}, {transform_indices = @transform_4, window_bounds = array<i64: 1, 1, 1, 128>}]} {
    %c0_i32 = arith.constant 0 : i32
    %0 = arith.cmpi eq, %arg2, %c0_i32 : i32
    %1 = arith.extui %0 : i1 to i32
    %c0_i32_0 = arith.constant 0 : i32
    %2 = arith.cmpi ne, %1, %c0_i32_0 : i32
    scf.if %2 {
      %cst_37 = arith.constant 0.000000e+00 : f32
      %35 = vector.broadcast %cst_37 : f32 to vector<1x1x1x128xf32>
      %c0_38 = arith.constant 0 : index
      %c0_39 = arith.constant 0 : index
      %c0_40 = arith.constant 0 : index
      %c0_41 = arith.constant 0 : index
      %36 = vector.load %arg5[%c0_38, %c0_39, %c0_40, %c0_41] : memref<1x1x1x128xf32, #tpu.memory_space<vmem>>, vector<1x1x1x128xf32>
      tpu.vector_store %arg5[%c0_38, %c0_39, %c0_40, %c0_41], %35 {strides = array<i32>} : memref<1x1x1x128xf32, #tpu.memory_space<vmem>>, vector<1x1x1x128xf32>,
      %cst_42 = arith.constant 0.000000e+00 : f32
      %37 = vector.broadcast %cst_42 : f32 to vector<1x1x1x128xf32>
      %c0_43 = arith.constant 0 : index
      %c0_44 = arith.constant 0 : index
      %c0_45 = arith.constant 0 : index
      %c0_46 = arith.constant 0 : index
      %38 = vector.load %arg6[%c0_43, %c0_44, %c0_45, %c0_46] : memref<1x1x1x128xf32, #tpu.memory_space<vmem>>, vector<1x1x1x128xf32>
      tpu.vector_store %arg6[%c0_43, %c0_44, %c0_45, %c0_46], %37 {strides = array<i32>} : memref<1x1x1x128xf32, #tpu.memory_space<vmem>>, vector<1x1x1x128xf32>,
      %cst_47 = arith.constant 0.000000e+00 : f32
      %39 = vector.broadcast %cst_47 : f32 to vector<1x1x1x128xf32>
      %c0_48 = arith.constant 0 : index
      %c0_49 = arith.constant 0 : index
      %c0_50 = arith.constant 0 : index
      %c0_51 = arith.constant 0 : index
      %40 = vector.load %arg7[%c0_48, %c0_49, %c0_50, %c0_51] : memref<1x1x1x128xf32, #tpu.memory_space<vmem>>, vector<1x1x1x128xf32>
      tpu.vector_store %arg7[%c0_48, %c0_49, %c0_50, %c0_51], %39 {strides = array<i32>} : memref<1x1x1x128xf32, #tpu.memory_space<vmem>>, vector<1x1x1x128xf32>,
    } else {
    }
    %c0 = arith.constant 0 : index
    %c0_1 = arith.constant 0 : index
    %c0_2 = arith.constant 0 : index
    %c0_3 = arith.constant 0 : index
    %3 = vector.load %arg3[%c0, %c0_1, %c0_2, %c0_3] : memref<2x1x2x128xf32, #tpu.memory_space<vmem>>, vector<2x1x2x128xf32>
    %4 = vector.shape_cast %3 : vector<2x1x2x128xf32> to vector<2x2x128xf32>
    %c0_4 = arith.constant 0 : index
    %c0_5 = arith.constant 0 : index
    %c0_6 = arith.constant 0 : index
    %c0_7 = arith.constant 0 : index
    %5 = vector.load %arg4[%c0_4, %c0_5, %c0_6, %c0_7] : memref<2x1x2x128xf32, #tpu.memory_space<vmem>>, vector<2x1x2x128xf32>
    %6 = vector.shape_cast %5 : vector<2x1x2x128xf32> to vector<2x2x128xf32>
    %7 = arith.mulf %4, %6 : vector<2x2x128xf32>
    %c0_8 = arith.constant 0 : index
    %c0_9 = arith.constant 0 : index
    %c0_10 = arith.constant 0 : index
    %c0_11 = arith.constant 0 : index
    %8 = vector.load %arg5[%c0_8, %c0_9, %c0_10, %c0_11] : memref<1x1x1x128xf32, #tpu.memory_space<vmem>>, vector<1x1x1x128xf32>
    %9 = vector.shape_cast %8 : vector<1x1x1x128xf32> to vector<1x128xf32>
    %cst = arith.constant dense<0.000000e+00> : vector<2x128xf32>
    %10 = vector.multi_reduction <add>, %7, %cst [0] : vector<2x2x128xf32> to vector<2x128xf32>
    %cst_12 = arith.constant dense<0.000000e+00> : vector<128xf32>
    %11 = vector.multi_reduction <add>, %10, %cst_12 [0] : vector<2x128xf32> to vector<128xf32>
    %12 = vector.shape_cast %11 : vector<128xf32> to vector<1x128xf32>
    %13 = arith.addf %9, %12 : vector<1x128xf32>
    %c0_13 = arith.constant 0 : index
    %c0_14 = arith.constant 0 : index
    %c0_15 = arith.constant 0 : index
    %c0_16 = arith.constant 0 : index
    %14 = vector.load %arg5[%c0_13, %c0_14, %c0_15, %c0_16] : memref<1x1x1x128xf32, #tpu.memory_space<vmem>>, vector<1x1x1x128xf32>
    %15 = vector.shape_cast %14 : vector<1x1x1x128xf32> to vector<1x128xf32>
    %16 = vector.shape_cast %13 : vector<1x128xf32> to vector<1x1x1x128xf32>
    tpu.vector_store %arg5[%c0_13, %c0_14, %c0_15, %c0_16], %16 {strides = array<i32>} : memref<1x1x1x128xf32, #tpu.memory_space<vmem>>, vector<1x1x1x128xf32>,
    %c0_17 = arith.constant 0 : index
    %c0_18 = arith.constant 0 : index
    %c0_19 = arith.constant 0 : index
    %c0_20 = arith.constant 0 : index
    %17 = vector.load %arg6[%c0_17, %c0_18, %c0_19, %c0_20] : memref<1x1x1x128xf32, #tpu.memory_space<vmem>>, vector<1x1x1x128xf32>
    %18 = vector.shape_cast %17 : vector<1x1x1x128xf32> to vector<1x128xf32>
    %cst_21 = arith.constant dense<0.000000e+00> : vector<2x128xf32>
    %19 = vector.multi_reduction <add>, %4, %cst_21 [0] : vector<2x2x128xf32> to vector<2x128xf32>
    %cst_22 = arith.constant dense<0.000000e+00> : vector<128xf32>
    %20 = vector.multi_reduction <add>, %19, %cst_22 [0] : vector<2x128xf32> to vector<128xf32>
    %21 = vector.shape_cast %20 : vector<128xf32> to vector<1x128xf32>
    %22 = arith.addf %18, %21 : vector<1x128xf32>
    %c0_23 = arith.constant 0 : index
    %c0_24 = arith.constant 0 : index
    %c0_25 = arith.constant 0 : index
    %c0_26 = arith.constant 0 : index
    %23 = vector.load %arg6[%c0_23, %c0_24, %c0_25, %c0_26] : memref<1x1x1x128xf32, #tpu.memory_space<vmem>>, vector<1x1x1x128xf32>
    %24 = vector.shape_cast %23 : vector<1x1x1x128xf32> to vector<1x128xf32>
    %25 = vector.shape_cast %22 : vector<1x128xf32> to vector<1x1x1x128xf32>
    tpu.vector_store %arg6[%c0_23, %c0_24, %c0_25, %c0_26], %25 {strides = array<i32>} : memref<1x1x1x128xf32, #tpu.memory_space<vmem>>, vector<1x1x1x128xf32>,
    %c0_27 = arith.constant 0 : index
    %c0_28 = arith.constant 0 : index
    %c0_29 = arith.constant 0 : index
    %c0_30 = arith.constant 0 : index
    %26 = vector.load %arg7[%c0_27, %c0_28, %c0_29, %c0_30] : memref<1x1x1x128xf32, #tpu.memory_space<vmem>>, vector<1x1x1x128xf32>
    %27 = vector.shape_cast %26 : vector<1x1x1x128xf32> to vector<1x128xf32>
    %cst_31 = arith.constant dense<0.000000e+00> : vector<2x128xf32>
    %28 = vector.multi_reduction <add>, %6, %cst_31 [0] : vector<2x2x128xf32> to vector<2x128xf32>
    %cst_32 = arith.constant dense<0.000000e+00> : vector<128xf32>
    %29 = vector.multi_reduction <add>, %28, %cst_32 [0] : vector<2x128xf32> to vector<128xf32>
    %30 = vector.shape_cast %29 : vector<128xf32> to vector<1x128xf32>
    %31 = arith.addf %27, %30 : vector<1x128xf32>
    %c0_33 = arith.constant 0 : index
    %c0_34 = arith.constant 0 : index
    %c0_35 = arith.constant 0 : index
    %c0_36 = arith.constant 0 : index
    %32 = vector.load %arg7[%c0_33, %c0_34, %c0_35, %c0_36] : memref<1x1x1x128xf32, #tpu.memory_space<vmem>>, vector<1x1x1x128xf32>
    %33 = vector.shape_cast %32 : vector<1x1x1x128xf32> to vector<1x128xf32>
    %34 = vector.shape_cast %31 : vector<1x128xf32> to vector<1x1x1x128xf32>
    tpu.vector_store %arg7[%c0_33, %c0_34, %c0_35, %c0_36], %34 {strides = array<i32>} : memref<1x1x1x128xf32, #tpu.memory_space<vmem>>, vector<1x1x1x128xf32>,
    return
  }
  func.func @transform_0(%arg0: i32, %arg1: i32, %arg2: i32) -> (i32, i32, i32, i32) {
    %c1_i32 = arith.constant 1 : i32
    %0 = arith.muli %arg1, %c1_i32 : i32
    %1 = arith.addi %0, %arg2 : i32
    %c0_i32 = arith.constant 0 : i32
    %c0_i32_0 = arith.constant 0 : i32
    %c0_i32_1 = arith.constant 0 : i32
    return %c0_i32, %arg0, %1, %c0_i32_0 : i32, i32, i32, i32
  }
  func.func @transform_1(%arg0: i32, %arg1: i32, %arg2: i32) -> (i32, i32, i32, i32) {
    %c1_i32 = arith.constant 1 : i32
    %0 = arith.muli %arg1, %c1_i32 : i32
    %1 = arith.addi %0, %arg2 : i32
    %c0_i32 = arith.constant 0 : i32
    %c0_i32_0 = arith.constant 0 : i32
    %c0_i32_1 = arith.constant 0 : i32
    return %c0_i32, %arg0, %1, %c0_i32_0 : i32, i32, i32, i32
  }
  func.func @transform_2(%arg0: i32, %arg1: i32, %arg2: i32) -> (i32, i32, i32, i32) {
    %c0_i32 = arith.constant 0 : i32
    %c0_i32_0 = arith.constant 0 : i32
    %c0_i32_1 = arith.constant 0 : i32
    return %arg0, %arg1, %c0_i32, %c0_i32_0 : i32, i32, i32, i32
  }
  func.func @transform_3(%arg0: i32, %arg1: i32, %arg2: i32) -> (i32, i32, i32, i32) {
    %c0_i32 = arith.constant 0 : i32
    %c0_i32_0 = arith.constant 0 : i32
    %c0_i32_1 = arith.constant 0 : i32
    return %arg0, %arg1, %c0_i32, %c0_i32_0 : i32, i32, i32, i32
  }
  func.func @transform_4(%arg0: i32, %arg1: i32, %arg2: i32) -> (i32, i32, i32, i32) {
    %c0_i32 = arith.constant 0 : i32
    %c0_i32_0 = arith.constant 0 : i32
    %c0_i32_1 = arith.constant 0 : i32
    return %arg0, %arg1, %c0_i32, %c0_i32_0 : i32, i32, i32, i32
  }
}

</mosaic_0001>

<bundles_post_ra>
// kernel: tpu_custom_call.1
= control target key start
LH: loop header
LB: loop body
LE: loop exit
PB: predicated region body
PF: predicated region fallthrough
CT: control target
= control target key end

     0   :  { %s1239_s0 = inlined_call_operand.hbm [shape: f32[2,4,2,128], index: 0, kind: input, shape index: {}]   ;;  %s1240_s1 = inlined_call_operand.hbm [shape: f32[2,4,2,128], index: 1, kind: input, shape index: {}]   ;;  %s1241_s2 = inlined_call_operand.hbm [shape: f32[4,1,1,128], index: 2, kind: output, shape index: {0}]   ;;  %s1242_s3 = inlined_call_operand.hbm [shape: f32[4,1,1,128], index: 3, kind: output, shape index: {1}]   ;;  %s1243_s4 = inlined_call_operand.hbm [shape: f32[4,1,1,128], index: 4, kind: output, shape index: {2}]  }
   0x1   :  { %1249 = sst [smem:[#allocation16_spill]] %s1239_s0 }
   0x2   :  { %10 = vsyncpa [#allocation3], 0 }
   0x3   :  { %12 = vsyncpa [#allocation3 + $0x1], 0 }
   0x4   :  { %13 = vsyncpa [#allocation6], 0 }
   0x5   :  { %15 = vsyncpa [#allocation6 + $0x1], 0 }
   0x6   :  { %16 = vsyncpa [#allocation4], 0 }
   0x7   :  { %18 = vsyncpa [#allocation4 + $0x1], 0 }
   0x8   :  { %19 = vsyncpa [#allocation9], 0 }
   0x9   :  { %21 = vsyncpa [#allocation9 + $0x1], 0  ;;  %s910_s15 = smov 0   ;;  %s912_s16 = smov 0  }
   0xa   :  { %s914_s17 = smov 0   ;;  %s916_s18 = smov 0  }
   0xb   :  { %s918_s19 = smov 0   ;;  %s920_s20 = smov 0  }
   0xc LB: > { %s941_s21 = sadd.s32 4294967295, %s874_s20   ;;  %s1244_s22 = sadd.s32 4294967294, %s874_s20   ;;  %s874_s20 = sphi %s920_s20, %s27_s20   ;;  %s870_s19 = sphi %s918_s19, %s1268_s19   ;;  %s866_s18 = sphi %s916_s18, %s1267_s18   ;;  %s862_s17 = sphi %s914_s17, %s1266_s17   ;;  %s858_s16 = sphi %s912_s16, %s1265_s16   ;;  %s854_s15 = sphi %s910_s15, %s1264_s15  }
   0xd   : > { %s46_s23 = sadd.s32 1, %s870_s19  ;;  %s57_s24 = sadd.s32 1, %s862_s17 }
   0xe   : > { %p48_p0 = scmp.ge.s32.totalorder %s46_s23, 4  ;;  %p64_p1 = scmp.ne.s32.totalorder %s862_s17, %s858_s16 }
   0xf   : > { %p65_p2 = scmp.eq.s32.totalorder %s874_s20, 0  ;;  %p70_p3 = scmp.ne.s32.totalorder %s858_s16, %s854_s15 }
  0x10   : > { %s1270_s23 = smov (%p48_p0, %s46_s23), 0  ;;  %p71_p5 = scmp.eq.s32.totalorder %s941_s21, 0 }
  0x11   : > { %1250 = sst [smem:[#allocation15_spill]] %s1270_s23  ;;  %p953_p4 = por %p65_p2, %p64_p1 }
  0x12   : > { %s52_s26 = ssub.s32 %s870_s19, %s1270_s23  ;;  %p126_p6 = scmp.eq.s32.totalorder %s941_s21, 3 }
  0x13   : > { %p55_p7 = scmp.eq.s32.totalorder %s52_s26, 0  ;;  %p961_p8 = por %p71_p5, %p70_p3 }
  0x14   : > { %p965_p9 = por %p126_p6, %p64_p1  ;;  %p132_p10 = scmp.eq.s32.totalorder %s1244_s22, 3 }
  0x15   : > { %s1252_s27 = scalar_select %p961_p8, 1, 0 }
  0x16   : > { %s1253_s28 = scalar_select %p965_p9, 1, 0 }
  0x17   : > { %s972_s29 = scalar_select %p55_p7, %s862_s17, %s57_s24  }
  0x18   : > { %p974_p11 = por %p132_p10, %p70_p3  ;;  %p614_p12 = scmp.lt.s32.totalorder %s874_s20, 4 }
  0x19   : > { %s980_s5 = sand.u32 1, %s862_s17   ;;  %s576_s7 = sshll.u32 %s870_s19, 5 }
  0x1a   : > { %s1254_s30 = scalar_select %p974_p11, 1, 0 }
  0x1b   : > { %s575_s6 = sshll.u32 %s980_s5, 2  ;;  %s1255_s0 = sld [smem:[#allocation16_spill]] }
  0x1c   : > { %s212_s11 = scalar_lea.vmem [#allocation2], %s575_s6  ;;  %p997_p13 = pnand %p614_p12, %p953_p4 }
  0x1d   : > { %s220_s12 = sshll.u32 %s212_s11, 4  ;;  %s209_s14 = scalar_lea.sflag [#allocation3], %s980_s5  ;;  %s993_s12 = int_to_ptr.vmem [resolvable:$true] %s220_s12 }
  0x1e   : > { %p670_p1 = pneg %p997_p13 }
  0x21   : > { %s989_s10 = scalar_lea.hbm %s1255_s0, %s576_s7  ;;  %s673_s9 = scalar_lea.hbm %s1255_s0, 256 }
  0x22   : > { %s668_s24 = scalar_lea.hbm %s989_s10, 64  ;;  %p674_p4 = scmp.lt.u32.totalorder %s989_s10, %s1255_s0 }
  0x23   : > { %p669_p0 = scmp.ne.s32.totalorder %s989_s10, %s668_s24  ;;  %p675_p5 = scmp.lt.u32.totalorder %s673_s9, %s668_s24 }
  0x24   : > { %p677_p7 = scmp.lt.u32.totalorder %s668_s24, %s989_s10 }
  0x25   : > { %p671_p2 = pnand %p670_p1, %p669_p0  ;;  %p676_p6 = por %p675_p5, %p674_p4 }
  0x27   : > { %p672_p3 = pneg %p671_p2  ;;  %p678_p10 = por %p677_p7, %p676_p6 }
  0x29   : > { %p679_p12 = pnand %p678_p10, %p672_p3 }
  0x2b   : > { %682 = shalt.err (!%p679_p12)
}
  0x2c   : > { %s683_s22 = scalar_lea.vmem %s993_s12, 64  ;;  %s876_s26 = smov [#allocation2]  }
  0x2d   : > { %p684_p0 = scmp.ne.s32.totalorder %s993_s12, %s683_s22  ;;  %s688_s8 = sshll.u32 %s876_s26, 4  ;;  %s689_s8 = int_to_ptr.vmem [resolvable:$false] %s688_s8 }
  0x2e   : > { %s690_s25 = scalar_lea.vmem %s689_s8, 128  ;;  %p691_p9 = scmp.lt.s32.totalorder %s993_s12, %s689_s8 }
  0x2f   : > { %p686_p2 = pnand %p684_p0, %p670_p1  ;;  %p692_p4 = scmp.lt.s32.totalorder %s690_s25, %s683_s22 }
  0x31   : > { %p687_p11 = pneg %p686_p2  ;;  %p693_p5 = por %p692_p4, %p691_p9 }
  0x33   : > { %p694_p6 = pnand %p693_p5, %p687_p11 }
  0x35   : > { %697 = shalt.err (!%p694_p6)
}
  0x36   : > { %s1247_s24 = smov 128   ;;  %s878_s9 = smov 32  }
  0x37   : > { %s879_s11 = smov 2   ;;  %p579_p9 = scmp.ge.s32.totalorder %s874_s20, 1 }
  0x38   : > { %600 = dma.hbm_to_vmem [thread:$0]  (!%p997_p13), %s989_s10, 64, %s993_s12, %s209_s14, %s1247_s24, %s878_s9, %s879_s11  }
  0x39   : > { %p250_p11 = scmp.lt.s32.totalorder %s874_s20, 5  ;;  %s1043_s25 = scalar_lea.hbm %s1240_s1, %s576_s7 }
  0x3a   : > { %s234_s0 = scalar_lea.vmem [#allocation5], %s575_s6  ;;  %s231_s10 = scalar_lea.sflag [#allocation6], %s980_s5 }
  0x3b   : > { %p1034_p3 = pnand %p579_p9, %p250_p11  ;;  %s242_s23 = sshll.u32 %s234_s0, 4  ;;  %s1047_s23 = int_to_ptr.vmem [resolvable:$true] %s242_s23 }
  0x3c   : > { %s698_s12 = scalar_lea.hbm %s1043_s25, 64  ;;  %s703_s7 = scalar_lea.hbm %s1240_s1, 256 }
  0x3d   : > { %p699_p7 = scmp.ne.s32.totalorder %s1043_s25, %s698_s12  ;;  %p704_p0 = scmp.lt.u32.totalorder %s1043_s25, %s1240_s1 }
  0x3e   : > { %p705_p2 = scmp.lt.u32.totalorder %s703_s7, %s698_s12  ;;  %p707_p5 = scmp.lt.u32.totalorder %s698_s12, %s1043_s25 }
  0x3f   : > { %p701_p10 = pnand %p699_p7, %p670_p1 }
  0x40   : > { %p706_p4 = por %p705_p2, %p704_p0 }
  0x41   : > { %p702_p12 = pneg %p701_p10 }
  0x42   : > { %p708_p6 = por %p707_p5, %p706_p4 }
  0x44   : > { %p709_p9 = pnand %p708_p6, %p702_p12 }
  0x46   : > { %712 = shalt.err (!%p709_p9)
}
  0x47   : > { %s713_s0 = scalar_lea.vmem %s1047_s23, 64  ;;  %s880_s6 = smov [#allocation5]  }
  0x48   : > { %p714_p11 = scmp.ne.s32.totalorder %s1047_s23, %s713_s0  ;;  %s718_s14 = sshll.u32 %s880_s6, 4  ;;  %s719_s14 = int_to_ptr.vmem [resolvable:$false] %s718_s14 }
  0x49   : > { %s720_s24 = scalar_lea.vmem %s719_s14, 128  ;;  %p721_p8 = scmp.lt.s32.totalorder %s1047_s23, %s719_s14 }
  0x4a   : > { %p716_p7 = pnand %p714_p11, %p670_p1  ;;  %p722_p0 = scmp.lt.s32.totalorder %s720_s24, %s713_s0 }
  0x4c   : > { %p717_p10 = pneg %p716_p7  ;;  %p723_p2 = por %p722_p0, %p721_p8 }
  0x4e   : > { %p724_p4 = pnand %p723_p2, %p717_p10 }
  0x50   : > { %727 = shalt.err (!%p724_p4)
}
  0x51   : > { %s1258_s12 = smov 128   ;;  %254 = sbr.rel (%p1034_p3) target bundleno = 177 (0xb1), region = 28 }
  0x52   : > { %603 = dma.hbm_to_vmem [thread:$0]  (!%p997_p13), %s1043_s25, 64, %s1047_s23, %s231_s10, %s1258_s12, %s878_s9, %s879_s11  }
  0x53   : > { %s1081_s26 = sand.u32 (!%p1034_p3), 1, %s858_s16   ;;  %p1259_p8 = scmp.ne.s32.totalorder (!%p1034_p3), %s1252_s27, 0 }
  0x54   : > { %s580_s7 = sshll.u32 (!%p1034_p3), %s1081_s26, 2  ;;  %s257_s8 = scalar_lea.sflag (!%p1034_p3), [#allocation3], %s1081_s26 }
  0x55   : > { %s260_s13 = scalar_lea.vmem (!%p1034_p3), [#allocation2], %s580_s7 }
  0x58   : > { %837 = dma.done.wait (%p1259_p8), %s257_s8, 64  }
  0x59   : > { %839 = vsyncadd (%p1259_p8), %s257_s8, 4294967232  ;;  %s266_s23 = scalar_lea.sflag [#allocation6], %s1081_s26  ;;  %s269_s5 = scalar_lea.vmem [#allocation5], %s580_s7 }
  0x5a   : > { %841 = dma.done.wait (%p1259_p8), %s266_s23, 64  }
  0x5b   : > { %843 = vsyncadd (%p1259_p8), %s266_s23, 4294967232  ;;  %s1095_s9 = scalar_lea.vmem [#allocation8], %s1081_s26  ;;  %v881_v0 = vmov 0.0   ;;  %s1099_s11 = scalar_lea.vmem [#allocation7], %s1081_s26  ;;  %vm322_vm0 = vcmask 1041408  }
  0x5c   : > { %313 = vst [vmem:[%s1095_s9] sm:$0x1] %v881_v0  ;;  %312 = vst [vmem:[%s1099_s11] sm:$0x1] %v881_v0  ;;  %s1103_s22 = scalar_lea.vmem [#allocation10], %s1081_s26  ;;  %v315_v1 = vld [vmem:[%s260_s13] sm:$0x3]  ;;  %s365_s27 = sand.u32 1, %s941_s21  }
  0x5d   : > { %314 = vst [vmem:[%s1103_s22] sm:$0x1] %v881_v0  ;;  %v316_v2 = vld [vmem:[%s260_s13 + $0x2] sm:$0x3]  ;;  %v317_v3 = vld [vmem:[%s269_s5] sm:$0x3]  ;;  %v336_v4 = vsel %vm322_vm0, %v315_v1, 0.0 }
  0x5e   : > { %v337_v5 = vsel %vm322_vm0, %v316_v2, 0.0  ;;  %v318_v6 = vld [vmem:[%s269_s5 + $0x2] sm:$0x3]  ;;  %v319_v7 = vmul.f32 %v317_v3, %v315_v1  ;;  %v349_v10 = vsel %vm322_vm0, %v317_v3, 0.0  ;;  %s411_s25 = sshll.u32 %s1103_s22, 4  ;;  %s582_s10 = sshll.u32 %s866_s18, 4  ;;  %s1121_s25 = int_to_ptr.vmem [resolvable:$true] %s411_s25 }
  0x5f   : > { %v338_v8 = vadd.f32 %v337_v5, %v336_v4  ;;  %v320_v9 = vmul.f32 %v318_v6, %v316_v2  ;;  %v350_v11 = vsel %vm322_vm0, %v318_v6, 0.0  ;;  %s397_s0 = sshll.u32 %s1095_s9, 4  ;;  %s383_s6 = sshll.u32 %s1099_s11, 4  ;;  %s1130_s0 = int_to_ptr.vmem [resolvable:$true] %s397_s0  ;;  %s1143_s6 = int_to_ptr.vmem [resolvable:$true] %s383_s6 }
  0x60   : > { %v323_v12 = vsel %vm322_vm0, %v319_v7, 0.0  ;;  %v351_v13 = vadd.f32 %v350_v11, %v349_v10  ;;  %s1128_s24 = scalar_lea.hbm %s1242_s3, %s582_s10  ;;  %s1135_s7 = scalar_lea.hbm %s1243_s4, %s582_s10 }
  0x61   : > { %v339_v14 = vsel %vm322_vm0, %v338_v8, 0.0  ;;  %v324_v15 = vsel %vm322_vm0, %v320_v9, 0.0  ;;  %s1141_s23 = scalar_lea.hbm %s1241_s2, %s582_s10  ;;  %s1146_s5 = scalar_lea.sflag [#allocation9], %s365_s27 }
  0x62   : > { %v340_v16 = vrot.slane %v339_v14, 4  ;;  %v325_v17 = vadd.f32 %v324_v15, %v323_v12  ;;  %v352_v18 = vsel %vm322_vm0, %v351_v13, 0.0  ;;  %s728_s21 = scalar_lea.vmem %s1130_s0, 16  ;;  %p1260_p1 = scmp.ne.s32.totalorder %s1253_s28, 0 }
  0x63   : > { %v353_v19 = vrot.slane %v352_v18, 4  ;;  %v335_v31 = vld [vmem:[%s1095_s9] sm:$0x1]  ;;  %p729_p13 = scmp.ne.s32.totalorder %s1130_s0, %s728_s21  ;;  %s882_s14 = smov [#allocation8]  }
  0x64   : > { %v341_v20 = vadd.f32 %v340_v16, %v339_v14  ;;  %v326_v21 = vsel %vm322_vm0, %v325_v17, 0.0  ;;  %v348_v35 = vld [vmem:[%s1103_s22] sm:$0x1]  ;;  %s732_s18 = sshll.u32 %s882_s14, 4  ;;  %s733_s18 = int_to_ptr.vmem [resolvable:$false] %s732_s18 }
  0x65   : > { %v327_v22 = vrot.slane %v326_v21, 4  ;;  %v354_v23 = vadd.f32 %v353_v19, %v352_v18  ;;  %v321_v39 = vld [vmem:[%s1099_s11] sm:$0x1]  ;;  %p730_p3 = pnand %p729_p13, %p1260_p1  ;;  %p735_p5 = scmp.lt.s32.totalorder %s1130_s0, %s733_s18 }
  0x66   : > { %v342_v24 = vrot.slane %v341_v20, 2 }
  0x67   : > { %v328_v25 = vadd.f32 %v327_v22, %v326_v21  ;;  %v355_v26 = vrot.slane %v354_v23, 2  ;;  %p731_p12 = pneg %p730_p3 }
  0x68   : > { %v343_v27 = vadd.f32 %v342_v24, %v341_v20 }
  0x69   : > { %v329_v28 = vrot.slane %v328_v25, 2  ;;  %v356_v29 = vadd.f32 %v355_v26, %v354_v23 }
  0x6a   : > { %v344_v30 = vrot.slane %v343_v27, 1 }
  0x6b   : > { %v330_v32 = vadd.f32 %v329_v28, %v328_v25  ;;  %v357_v33 = vrot.slane %v356_v29, 1 }
  0x6c   : > { %v345_v34 = vadd.f32 %v344_v30, %v343_v27 }
  0x6d   : > { %v331_v36 = vrot.slane %v330_v32, 1  ;;  %v358_v37 = vadd.f32 %v357_v33, %v356_v29 }
  0x6e   : > { %v346_v38 = vadd.f32 %v345_v34, %v335_v31 }
  0x6f   : > { %v332_v40 = vadd.f32 %v331_v36, %v330_v32  ;;  %v359_v41 = vadd.f32 %v358_v37, %v348_v35 }
  0x70   : > { %347 = vst [vmem:[%s1095_s9] sm:$0x1] %v346_v38  ;;  %s734_s9 = scalar_lea.vmem %s733_s18, 32 }
  0x71   : > { %v333_v42 = vadd.f32 %v332_v40, %v321_v39  ;;  %360 = vst [vmem:[%s1103_s22] sm:$0x1] %v359_v41  ;;  %p736_p6 = scmp.lt.s32.totalorder %s734_s9, %s728_s21 }
  0x73   : > { %p737_p9 = por %p736_p6, %p735_p5 }
  0x75   : > { %p738_p11 = pnand %p737_p9, %p731_p12 }
  0x77   : > { %741 = shalt.err (!%p738_p11)
}
  0x78   : > { %s742_s22 = scalar_lea.hbm %s1128_s24, 16  ;;  %s746_s12 = scalar_lea.hbm %s1242_s3, 64 }
  0x79   : > { %p743_p7 = scmp.ne.s32.totalorder %s1128_s24, %s742_s22  ;;  %p747_p2 = scmp.lt.u32.totalorder %s1128_s24, %s1242_s3 }
  0x7a   : > { %p748_p4 = scmp.lt.u32.totalorder %s746_s12, %s742_s22  ;;  %p750_p13 = scmp.lt.u32.totalorder %s742_s22, %s1128_s24 }
  0x7b   : > { %p744_p10 = pnand %p743_p7, %p1260_p1 }
  0x7c   : > { %p749_p8 = por %p748_p4, %p747_p2 }
  0x7d   : > { %p745_p0 = pneg %p744_p10 }
  0x7e   : > { %p751_p3 = por %p750_p13, %p749_p8 }
  0x80   : > { %p752_p12 = pnand %p751_p3, %p745_p0 }
  0x82   : > { %755 = shalt.err (!%p752_p12)
}
  0x83   : > { %592 = dma.vmem_to_hbm [thread:$0]  (%p1260_p1), %s1130_s0, 16, %s1128_s24, %s1146_s5  }
  0x84   : > { %s756_s21 = scalar_lea.vmem %s1121_s25, 16  ;;  %s883_s14 = smov [#allocation10]  }
  0x85   : > { %p757_p5 = scmp.ne.s32.totalorder %s1121_s25, %s756_s21  ;;  %s760_s18 = sshll.u32 %s883_s14, 4  ;;  %s761_s18 = int_to_ptr.vmem [resolvable:$false] %s760_s18 }
  0x86   : > { %s762_s9 = scalar_lea.vmem %s761_s18, 32  ;;  %p763_p11 = scmp.lt.s32.totalorder %s1121_s25, %s761_s18 }
  0x87   : > { %p758_p6 = pnand %p757_p5, %p1260_p1  ;;  %p764_p7 = scmp.lt.s32.totalorder %s762_s9, %s756_s21 }
  0x89   : > { %p759_p9 = pneg %p758_p6  ;;  %p765_p10 = por %p764_p7, %p763_p11 }
  0x8b   : > { %p766_p0 = pnand %p765_p10, %p759_p9 }
  0x8d   : > { %769 = shalt.err (!%p766_p0)
}
  0x8e   : > { %s770_s0 = scalar_lea.hbm %s1135_s7, 16  ;;  %s774_s27 = scalar_lea.hbm %s1243_s4, 64 }
  0x8f   : > { %p771_p2 = scmp.ne.s32.totalorder %s1135_s7, %s770_s0  ;;  %p775_p13 = scmp.lt.u32.totalorder %s1135_s7, %s1243_s4 }
  0x90   : > { %p776_p3 = scmp.lt.u32.totalorder %s774_s27, %s770_s0  ;;  %p778_p5 = scmp.lt.u32.totalorder %s770_s0, %s1135_s7 }
  0x91   : > { %p772_p4 = pnand %p771_p2, %p1260_p1 }
  0x92   : > { %p777_p12 = por %p776_p3, %p775_p13 }
  0x93   : > { %p773_p8 = pneg %p772_p4 }
  0x94   : > { %p779_p6 = por %p778_p5, %p777_p12 }
  0x96   : > { %p780_p9 = pnand %p779_p6, %p773_p8 }
  0x98   : > { %783 = shalt.err (!%p780_p9)
}
  0x99   : > { %593 = dma.vmem_to_hbm [thread:$0]  (%p1260_p1), %s1121_s25, 16, %s1135_s7, %s1146_s5   ;;  %334 = vst [vmem:[%s1099_s11] sm:$0x1] %v333_v42 }
  0x9a   : > { %s362_s8 = scalar_lea.sflag [#allocation4], %s1081_s26  ;;  %s784_s13 = scalar_lea.vmem %s1143_s6, 16 }
  0x9b   : > { %p785_p11 = scmp.ne.s32.totalorder %s1143_s6, %s784_s13  ;;  %s884_s21 = smov [#allocation7]  }
  0x9c   : > { %s788_s14 = sshll.u32 %s884_s21, 4  ;;  %s789_s14 = int_to_ptr.vmem [resolvable:$false] %s788_s14 }
  0x9d   : > { %p786_p7 = pnand %p785_p11, %p1260_p1  ;;  %s790_s18 = scalar_lea.vmem %s789_s14, 32 }
  0x9e   : > { %p791_p0 = scmp.lt.s32.totalorder %s1143_s6, %s789_s14  ;;  %p792_p2 = scmp.lt.s32.totalorder %s790_s18, %s784_s13 }
  0x9f   : > { %p787_p10 = pneg %p786_p7 }
  0xa0   : > { %p793_p4 = por %p792_p2, %p791_p0 }
  0xa2   : > { %p794_p8 = pnand %p793_p4, %p787_p10 }
  0xa4   : > { %797 = shalt.err (!%p794_p8)
}
  0xa5   : > { %s798_s26 = scalar_lea.hbm %s1141_s23, 16  ;;  %s802_s7 = scalar_lea.hbm %s1241_s2, 64 }
  0xa6   : > { %p799_p13 = scmp.ne.s32.totalorder %s1141_s23, %s798_s26  ;;  %p803_p5 = scmp.lt.u32.totalorder %s1141_s23, %s1241_s2 }
  0xa7   : > { %p804_p6 = scmp.lt.u32.totalorder %s802_s7, %s798_s26  ;;  %p806_p11 = scmp.lt.u32.totalorder %s798_s26, %s1141_s23 }
  0xa8   : > { %p800_p3 = pnand %p799_p13, %p1260_p1 }
  0xa9   : > { %p805_p9 = por %p804_p6, %p803_p5 }
  0xaa   : > { %p801_p12 = pneg %p800_p3 }
  0xab   : > { %p807_p7 = por %p806_p11, %p805_p9 }
  0xad   : > { %p808_p10 = pnand %p807_p7, %p801_p12 }
  0xaf   : > { %811 = shalt.err (!%p808_p10)
}
  0xb0   : > { %591 = dma.vmem_to_hbm [thread:$0]  (%p1260_p1), %s1143_s6, 16, %s1141_s23, %s362_s8  }
  0xb1 PF: > { %p615_p0 = scmp.ge.s32.totalorder %s874_s20, 2  ;;  %s423_s0 = sand.u32 1, %s854_s15  }
  0xb2   : > { %p1261_p2 = scmp.ne.s32.totalorder %s1254_s30, 0  ;;  %s424_s24 = scalar_lea.sflag [#allocation4], %s423_s0 }
  0xb4   : > { %p605_p4 = pnand %p615_p0, %p1261_p2 }
  0xb6   : > { %845 = dma.done.wait (!%p605_p4), %s424_s24, 16  }
  0xb7   : > { %847 = vsyncadd (!%p605_p4), %s424_s24, 4294967280  ;;  %s1262_s22 = sadd.s32 4294967294, %s874_s20  }
  0xb8   : > { %s431_s27 = sand.u32 1, %s1262_s22  }
  0xb9   : > { %s432_s10 = scalar_lea.sflag [#allocation9], %s431_s27 }
  0xba   : > { %849 = dma.done.wait (!%p605_p4), %s432_s10, 32  }
  0xbb   : > { %851 = vsyncadd (!%p605_p4), %s432_s10, 4294967264  ;;  %s27_s20 = sadd.s32 1, %s874_s20   ;;  %s1263_s28 = sld [smem:[#allocation15_spill]] }
  0xbc   : > { %p24_p1 = scmp.ge.s32.totalorder %s27_s20, 6   ;;  %s1264_s15 = smov %s858_s16 }
  0xbd   : > { %s1265_s16 = smov %s862_s17  ;;  %s1266_s17 = smov %s972_s29 }
  0xbe   : > { %s1267_s18 = smov %s870_s19  ;;  %26 = sbr.rel (!%p24_p1) target bundleno = 12 (0xc), region = 122 }
  0xc1   : > { %s1268_s19 = smov %s1263_s28 }
  0xc5   :  { %444 = vsyncpa [#allocation3], 1 }
  0xc6   :  { %446 = vsyncpa [#allocation3 + $0x1], 1 }
  0xc7   :  { %447 = vsyncpa [#allocation6], 1 }
  0xc8   :  { %449 = vsyncpa [#allocation6 + $0x1], 1 }
  0xc9   :  { %450 = vsyncpa [#allocation4], 1 }
  0xca   :  { %452 = vsyncpa [#allocation4 + $0x1], 1 }
  0xcb   :  { %453 = vsyncpa [#allocation9], 1 }
  0xcc   :  { %455 = vsyncpa [#allocation9 + $0x1], 1 }

</bundles_post_ra>
